<compile_context>
chip_gen: v7x
topology: tpu7x:2x2x1
jax: 0.10.0
libtpu: 0.0.40
codegen_flags: <defaults>
</compile_context>

<pallas_src>
import jax
import jax.numpy as jnp
from jax.experimental import pallas as pl
from jax.experimental.pallas import tpu as pltpu


def _round_up(x, m):
    return -(-x // m) * m


def critic_kernel(s_ref, a_ref, w1s_ref, w1a_ref, b_ref, w2_ref, w3_ref, out_ref):
    cdt = w2_ref.dtype
    H1 = w1s_ref.shape[1]
    H2 = w2_ref.shape[1]
    OP = w3_ref.shape[1]

    # Activation casts happen in-kernel (inputs arrive in their HBM dtype).
    s = s_ref[...].astype(cdt)
    a = a_ref[...].astype(cdt)

    # fc1 on the implicitly-concatenated [state, action] input:
    #   cat(s, a) @ W1 == s @ W1[:S] + a @ W1[S:]
    h1 = (jnp.dot(s, w1s_ref[...], preferred_element_type=jnp.float32)
          + jnp.dot(a, w1a_ref[...], preferred_element_type=jnp.float32)
          + b_ref[0:1, :H1])
    h1 = jnp.maximum(h1, 0.0).astype(cdt)

    h2 = jnp.dot(h1, w2_ref[...], preferred_element_type=jnp.float32) + b_ref[1:2, :H2]
    h2 = jnp.maximum(h2, 0.0).astype(cdt)

    # fc3 weights/bias are zero-padded to a 128-lane output: full-width,
    # unmasked stores and a lane-dense writeback DMA.
    out = jnp.dot(h2, w3_ref[...], preferred_element_type=jnp.float32) + b_ref[2:3, :OP]
    out_ref[...] = out.astype(out_ref.dtype)


def prepare_critic_params(params, state_dim, compute_dtype=jnp.bfloat16):
    """One-time weight prep, hoisted out of the per-call path:
       * split fc1's [in, H1] weight into state/action halves (in-kernel concat),
       * cast matmul weights to the MXU compute dtype,
       * zero-pad fc3 to a 128-lane output (lane-dense stores),
       * fold the three fp32 biases into one (3, W) array."""
    w1, b1, w2, b2, w3, b3 = params
    H1 = w1.shape[1]
    H2 = w2.shape[1]
    out_dim = w3.shape[1]
    out_pad = _round_up(out_dim, 128)

    w1_s = w1[:state_dim].astype(compute_dtype)
    w1_a = w1[state_dim:].astype(compute_dtype)
    w2_c = w2.astype(compute_dtype)
    w3_p = jnp.zeros((H2, out_pad), w3.dtype).at[:, :out_dim].set(w3).astype(compute_dtype)

    bw = max(H1, H2, out_pad)
    b_all = jnp.zeros((3, bw), jnp.float32)
    b_all = b_all.at[0, :H1].set(b1.reshape(-1).astype(jnp.float32))
    b_all = b_all.at[1, :H2].set(b2.reshape(-1).astype(jnp.float32))
    b_all = b_all.at[2, :out_dim].set(b3.reshape(-1).astype(jnp.float32))

    return (w1_s, w1_a, b_all, w2_c, w3_p, out_dim)


def _select_tile(B, tm_target):
    """Pick (tm, B_pad): minimize batch padding, keep >=2 grid steps for
    larger batches (v7x dual TensorCore), round rows to 16 (bf16 sublane pack)."""
    steps = pl.cdiv(B, tm_target)
    if B >= 256:                      # enough work to be worth splitting over 2 TCs
        steps = max(steps, 2)
    tm = _round_up(-(-B // steps), 16)
    return tm, steps * tm


def critic_forward(state, action, prepared, *, tm_target=1024):
    """Critic forward pass. All matmul / bias / relu compute (plus the
    state/action concat and dtype casts) runs inside one batch-tiled Pallas
    kernel; the wrapper only does batch padding and the final slice."""
    w1_s, w1_a, b_all, w2_c, w3_p, out_dim = prepared
    B, state_dim = state.shape
    action_dim = action.shape[1]
    H1 = w1_s.shape[1]
    H2 = w2_c.shape[1]
    out_pad = w3_p.shape[1]

    tm, B_pad = _select_tile(B, tm_target)
    if B_pad != B:
        pad = ((0, B_pad - B), (0, 0))
        state = jnp.pad(state, pad)
        action = jnp.pad(action, pad)

    grid = (B_pad // tm,)

    def row_spec(cols):
        return pl.BlockSpec((tm, cols), lambda i: (i, 0))

    def const_spec(shape):
        return pl.BlockSpec(shape, lambda i: (0, 0))

    in_bytes = jnp.dtype(state.dtype).itemsize
    w_bytes = jnp.dtype(w2_c.dtype).itemsize
    cost = pl.CostEstimate(
        flops=2 * B_pad * ((state_dim + action_dim) * H1 + H1 * H2 + H2 * out_pad),
        transcendentals=0,
        bytes_accessed=(B_pad * (state_dim + action_dim) * in_bytes               # activations in
                        + ((state_dim + action_dim) * H1 + H1 * H2 + H2 * out_pad) * w_bytes
                        + b_all.size * 4                                          # fp32 biases
                        + B_pad * out_pad * 4),                                   # fp32 output
    )

    out = pl.pallas_call(
        critic_kernel,
        out_shape=jax.ShapeDtypeStruct((B_pad, out_pad), jnp.float32),
        grid=grid,
        in_specs=[
            row_spec(state_dim),        # state tile (cast in kernel)
            row_spec(action_dim),       # action tile
            const_spec(w1_s.shape),     # weights/biases: constant index map -> resident
            const_spec(w1_a.shape),
            const_spec(b_all.shape),
            const_spec(w2_c.shape),
            const_spec(w3_p.shape),
        ],
        out_specs=row_spec(out_pad),
        compiler_params=pltpu.CompilerParams(
            dimension_semantics=("parallel",)),   # batch tiles shard over TCs on v7x
        cost_estimate=cost,
    )(state, action, w1_s, w1_a, b_all, w2_c, w3_p)

    return out[:B, :out_dim]


def init_params(key, input_size, output_size):
    """Deterministic PyTorch-style uniform(-1/sqrt(fan_in), 1/sqrt(fan_in)) init.
    Weights are stored as [in, out] (transpose of nn.Linear.weight)."""
    dims = [(input_size, 16 * input_size),
            (16 * input_size, 16 * output_size),
            (16 * output_size, output_size)]
    params = []
    for (fan_in, fan_out) in dims:
        key, kw, kb = jax.random.split(key, 3)
        bound = 1.0 / jnp.sqrt(fan_in)
        w = jax.random.uniform(kw, (fan_in, fan_out), jnp.float32, -bound, bound)
        b = jax.random.uniform(kb, (1, fan_out), jnp.float32, -bound, bound)
        params += [w, b]
    return tuple(params)


def critic_reference(state, action, params):
    w1, b1, w2, b2, w3, b3 = params
    x = jnp.concatenate([state, action], axis=1)
    h1 = jnp.maximum(x @ w1 + b1, 0.0)
    h2 = jnp.maximum(h1 @ w2 + b2, 0.0)
    return h2 @ w3 + b3


if __name__ == "__main__":
    # Small, consistent shapes: input_size = state_dim + action_dim
    state_dim, action_dim = 6, 2
    input_size = state_dim + action_dim   # 8  -> fc1 hidden = 128
    output_size = 2                       #       fc2 hidden = 32, fc3 out = 2

    key = jax.random.PRNGKey(0)
    k_s, k_a, k_p = jax.random.split(key, 3)
    params = init_params(k_p, input_size, output_size)

    # One-time weight prep (hoisted out of the per-call path).
    prep_f32 = prepare_critic_params(params, state_dim, compute_dtype=jnp.float32)
    prep_bf16 = prepare_critic_params(params, state_dim, compute_dtype=jnp.bfloat16)

    # --- tiny batch (B=2): exact fp32 path vs reference ---
    batch = 2
    state = jax.random.normal(k_s, (batch, state_dim), jnp.float32)
    action = jax.random.normal(k_a, (batch, action_dim), jnp.float32)

    out_f32 = jax.block_until_ready(critic_forward(state, action, prep_f32))
    ref = critic_reference(state, action, params)
    assert out_f32.shape == (batch, output_size)
    assert jnp.allclose(out_f32, ref, atol=1e-5, rtol=1e-5), "fp32 mismatch vs reference"

    # bf16 MXU operands (default fast path), loose tolerance vs fp32 reference
    out_bf16 = jax.block_until_ready(critic_forward(state, action, prep_bf16))
    assert jnp.allclose(out_bf16, ref, atol=5e-2, rtol=5e-2), "bf16 mismatch vs reference"

    # --- larger batch: exercises multi-step grid (2 tiles -> v7x dual-TC split)
    #     and padding-aware tile selection (B=300 -> tm=160, pad 20 rows) ---
    batch2 = 300
    k_s2, k_a2 = jax.random.split(jax.random.PRNGKey(1))
    state2 = jax.random.normal(k_s2, (batch2, state_dim), jnp.float32)
    action2 = jax.random.normal(k_a2, (batch2, action_dim), jnp.float32)
    out2 = jax.block_until_ready(critic_forward(state2, action2, prep_bf16))
    ref2 = critic_reference(state2, action2, params)
    assert out2.shape == (batch2, output_size)
    assert jnp.allclose(out2, ref2, atol=5e-2, rtol=5e-2), "tiled bf16 mismatch vs reference"

    print("KERNEL_OK")
</pallas_src>

<mosaic_0001>
module attributes {stable_mosaic.version = 11 : i64} {
  func.func @critic_kernel(%arg0: i32, %arg1: memref<16x6xf32, #tpu.memory_space<vmem>>, %arg2: memref<16x2xf32, #tpu.memory_space<vmem>>, %arg3: memref<6x128xf32, #tpu.memory_space<vmem>>, %arg4: memref<2x128xf32, #tpu.memory_space<vmem>>, %arg5: memref<3x128xf32, #tpu.memory_space<vmem>>, %arg6: memref<128x32xf32, #tpu.memory_space<vmem>>, %arg7: memref<32x128xf32, #tpu.memory_space<vmem>>, %arg8: memref<16x128xf32, #tpu.memory_space<vmem>>) attributes {dimension_semantics = [#tpu.dimension_semantics<parallel>], iteration_bounds = array<i64: 1>, scalar_prefetch = 0 : i64, scratch_operands = 0 : i64, tpu.core_type = #tpu.core_type<tc>, window_params = [{transform_indices = @transform_0, window_bounds = array<i64: 16, 6>}, {transform_indices = @transform_1, window_bounds = array<i64: 16, 2>}, {pipeline_mode = #tpu.pipeline_mode<synchronous>, transform_indices = @transform_2, window_bounds = array<i64: 6, 128>}, {pipeline_mode = #tpu.pipeline_mode<synchronous>, transform_indices = @transform_3, window_bounds = array<i64: 2, 128>}, {pipeline_mode = #tpu.pipeline_mode<synchronous>, transform_indices = @transform_4, window_bounds = array<i64: 3, 128>}, {pipeline_mode = #tpu.pipeline_mode<synchronous>, transform_indices = @transform_5, window_bounds = array<i64: 128, 32>}, {pipeline_mode = #tpu.pipeline_mode<synchronous>, transform_indices = @transform_6, window_bounds = array<i64: 32, 128>}, {transform_indices = @transform_7, window_bounds = array<i64: 16, 128>}]} {
    %c0 = arith.constant 0 : index
    %c0_0 = arith.constant 0 : index
    %0 = vector.load %arg1[%c0, %c0_0] : memref<16x6xf32, #tpu.memory_space<vmem>>, vector<16x6xf32>
    %c0_1 = arith.constant 0 : index
    %c0_2 = arith.constant 0 : index
    %1 = vector.load %arg2[%c0_1, %c0_2] : memref<16x2xf32, #tpu.memory_space<vmem>>, vector<16x2xf32>
    %c0_3 = arith.constant 0 : index
    %c0_4 = arith.constant 0 : index
    %2 = vector.load %arg3[%c0_3, %c0_4] : memref<6x128xf32, #tpu.memory_space<vmem>>, vector<6x128xf32>
    %cst = arith.constant dense<0.000000e+00> : vector<16x128xf32>
    %3 = tpu.matmul %0, %2, %cst {dimension_numbers = #tpu.dot_dimension_numbers<[1], [0], [0], [1], [0, 0, 1, 1], [], []>} : vector<16x6xf32>, vector<6x128xf32>, vector<16x128xf32> -> vector<16x128xf32>
    %c0_5 = arith.constant 0 : index
    %c0_6 = arith.constant 0 : index
    %4 = vector.load %arg4[%c0_5, %c0_6] : memref<2x128xf32, #tpu.memory_space<vmem>>, vector<2x128xf32>
    %cst_7 = arith.constant dense<0.000000e+00> : vector<16x128xf32>
    %5 = tpu.matmul %1, %4, %cst_7 {dimension_numbers = #tpu.dot_dimension_numbers<[1], [0], [0], [1], [0, 0, 1, 1], [], []>} : vector<16x2xf32>, vector<2x128xf32>, vector<16x128xf32> -> vector<16x128xf32>
    %6 = arith.addf %3, %5 : vector<16x128xf32>
    %c0_8 = arith.constant 0 : index
    %c0_9 = arith.constant 0 : index
    %7 = vector.load %arg5[%c0_8, %c0_9] : memref<3x128xf32, #tpu.memory_space<vmem>>, vector<1x128xf32>
    %8 = vector.broadcast %7 : vector<1x128xf32> to vector<16x128xf32>
    %9 = arith.addf %6, %8 : vector<16x128xf32>
    %cst_10 = arith.constant 0.000000e+00 : f32
    %10 = vector.broadcast %cst_10 : f32 to vector<16x128xf32>
    %11 = arith.maximumf %9, %10 : vector<16x128xf32>
    %c0_11 = arith.constant 0 : index
    %c0_12 = arith.constant 0 : index
    %12 = vector.load %arg6[%c0_11, %c0_12] : memref<128x32xf32, #tpu.memory_space<vmem>>, vector<128x32xf32>
    %cst_13 = arith.constant dense<0.000000e+00> : vector<16x32xf32>
    %13 = tpu.matmul %11, %12, %cst_13 {dimension_numbers = #tpu.dot_dimension_numbers<[1], [0], [0], [1], [0, 0, 1, 1], [], []>} : vector<16x128xf32>, vector<128x32xf32>, vector<16x32xf32> -> vector<16x32xf32>
    %c1 = arith.constant 1 : index
    %c0_14 = arith.constant 0 : index
    %14 = vector.load %arg5[%c1, %c0_14] : memref<3x128xf32, #tpu.memory_space<vmem>>, vector<1x32xf32>
    %15 = vector.broadcast %14 : vector<1x32xf32> to vector<16x32xf32>
    %16 = arith.addf %13, %15 : vector<16x32xf32>
    %cst_15 = arith.constant 0.000000e+00 : f32
    %17 = vector.broadcast %cst_15 : f32 to vector<16x32xf32>
    %18 = arith.maximumf %16, %17 : vector<16x32xf32>
    %c0_16 = arith.constant 0 : index
    %c0_17 = arith.constant 0 : index
    %19 = vector.load %arg7[%c0_16, %c0_17] : memref<32x128xf32, #tpu.memory_space<vmem>>, vector<32x128xf32>
    %cst_18 = arith.constant dense<0.000000e+00> : vector<16x128xf32>
    %20 = tpu.matmul %18, %19, %cst_18 {dimension_numbers = #tpu.dot_dimension_numbers<[1], [0], [0], [1], [0, 0, 1, 1], [], []>} : vector<16x32xf32>, vector<32x128xf32>, vector<16x128xf32> -> vector<16x128xf32>
    %c2 = arith.constant 2 : index
    %c0_19 = arith.constant 0 : index
    %21 = vector.load %arg5[%c2, %c0_19] : memref<3x128xf32, #tpu.memory_space<vmem>>, vector<1x128xf32>
    %22 = vector.broadcast %21 : vector<1x128xf32> to vector<16x128xf32>
    %23 = arith.addf %20, %22 : vector<16x128xf32>
    %c0_20 = arith.constant 0 : index
    %c0_21 = arith.constant 0 : index
    %24 = vector.load %arg8[%c0_20, %c0_21] : memref<16x128xf32, #tpu.memory_space<vmem>>, vector<16x128xf32>
    tpu.vector_store %arg8[%c0_20, %c0_21], %23 {strides = array<i32>} : memref<16x128xf32, #tpu.memory_space<vmem>>, vector<16x128xf32>,
    return
  }
  func.func @transform_0(%arg0: i32) -> (i32, i32) {
    %c0_i32 = arith.constant 0 : i32
    %c0_i32_0 = arith.constant 0 : i32
    return %arg0, %c0_i32 : i32, i32
  }
  func.func @transform_1(%arg0: i32) -> (i32, i32) {
    %c0_i32 = arith.constant 0 : i32
    %c0_i32_0 = arith.constant 0 : i32
    return %arg0, %c0_i32 : i32, i32
  }
  func.func @transform_2(%arg0: i32) -> (i32, i32) {
    %c0_i32 = arith.constant 0 : i32
    %c0_i32_0 = arith.constant 0 : i32
    %c0_i32_1 = arith.constant 0 : i32
    return %c0_i32, %c0_i32_0 : i32, i32
  }
  func.func @transform_3(%arg0: i32) -> (i32, i32) {
    %c0_i32 = arith.constant 0 : i32
    %c0_i32_0 = arith.constant 0 : i32
    %c0_i32_1 = arith.constant 0 : i32
    return %c0_i32, %c0_i32_0 : i32, i32
  }
  func.func @transform_4(%arg0: i32) -> (i32, i32) {
    %c0_i32 = arith.constant 0 : i32
    %c0_i32_0 = arith.constant 0 : i32
    %c0_i32_1 = arith.constant 0 : i32
    return %c0_i32, %c0_i32_0 : i32, i32
  }
  func.func @transform_5(%arg0: i32) -> (i32, i32) {
    %c0_i32 = arith.constant 0 : i32
    %c0_i32_0 = arith.constant 0 : i32
    %c0_i32_1 = arith.constant 0 : i32
    return %c0_i32, %c0_i32_0 : i32, i32
  }
  func.func @transform_6(%arg0: i32) -> (i32, i32) {
    %c0_i32 = arith.constant 0 : i32
    %c0_i32_0 = arith.constant 0 : i32
    %c0_i32_1 = arith.constant 0 : i32
    return %c0_i32, %c0_i32_0 : i32, i32
  }
  func.func @transform_7(%arg0: i32) -> (i32, i32) {
    %c0_i32 = arith.constant 0 : i32
    %c0_i32_0 = arith.constant 0 : i32
    return %arg0, %c0_i32 : i32, i32
  }
}

</mosaic_0001>

<bundles_post_ra>
// kernel: tpu_custom_call.1
= control target key start
LH: loop header
LB: loop body
LE: loop exit
PB: predicated region body
PF: predicated region fallthrough
CT: control target
= control target key end

     0   :  { %vm40_vm0 = vcmask 1041408   ;;  %vm33_vm1 = vcmask 15360   ;;  %vm126_vm2 = vcmask 1045504   ;;  %vm119_vm3 = vcmask 48128   ;;  %s731_s0 = inlined_call_operand.vmem [shape: f32[16,6], index: 0, kind: input, shape index: {}]   ;;  %s732_s1 = inlined_call_operand.vmem [shape: f32[16,2], index: 1, kind: input, shape index: {}]   ;;  %s733_s2 = inlined_call_operand.vmem [shape: f32[6,128], index: 2, kind: input, shape index: {}]   ;;  %s734_s3 = inlined_call_operand.vmem [shape: f32[2,128], index: 3, kind: input, shape index: {}]   ;;  %s735_s4 = inlined_call_operand.vmem [shape: f32[3,128], index: 4, kind: input, shape index: {}]   ;;  %s736_s5 = inlined_call_operand.vmem [shape: f32[128,32], index: 5, kind: input, shape index: {}]   ;;  %s737_s6 = inlined_call_operand.vmem [shape: f32[32,128], index: 6, kind: input, shape index: {}]   ;;  %s738_s7 = inlined_call_operand.hbm [shape: f32[16,128], index: 7, kind: output, shape index: {}]  }
   0x1   :  { %v32_v0 = vld [vmem:[%s734_s3] sm:$0x3]  ;;  %v30_v2 = vld [vmem:[%s732_s1 + $0x8] sm:$0xff]  ;;  %v216_v7 = vld [vmem:[%s736_s5 + $0x10] sm:$0xff] }
   0x2   :  { %v29_v1 = vld [vmem:[%s732_s1] sm:$0xff]  ;;  %462 = vmatprep.subr.msk.mxu0 %vm40_vm0, %v32_v0  ;;  %v215_v6 = vld [vmem:[%s736_s5 + $0x8] sm:$0xff]  ;;  %v217_v9 = vld [vmem:[%s736_s5 + $0x18] sm:$0xff] }
   0x3   :  { %464 = vmatprep.mubr.msk.f32.mxu0 %vm33_vm1, %v29_v1  ;;  %v31_v3 = vld [vmem:[%s733_s2] sm:$0x3f]  ;;  %463 = vmatpush3.msk.msra.mxu0 %vm40_vm0, %v32_v0  ;;  %v522_v10 = vpack.c.bf16 %v217_v9, %v216_v7  ;;  %v219_v12 = vld [vmem:[%s736_s5 + $0x28] sm:$0xff] }
   0x4   :  { %v27_v4 = vld [vmem:[%s731_s0] sm:$0xff]  ;;  %465 = vmatmul.mubr.msk.f32.vlgmr.msra.gmra.mrb[0].mxu0 %vm33_vm1, %v30_v2  ;;  %467 = vmatprep.subr.msk.mxu0 %vm126_vm2, %v31_v3 }
   0x5   :  { %v214_v5 = vld [vmem:[%s736_s5] sm:$0xff]  ;;  %468 = vmatpush3.msk.msra.mxu0 %vm126_vm2, %v31_v3  ;;  %469 = vmatprep.mubr.msk.f32.mxu0 %vm119_vm3, %v27_v4 }
   0x6   :  { %v518_v8 = vpack.c.bf16 %v215_v6, %v214_v5  ;;  %v218_v11 = vld [vmem:[%s736_s5 + $0x20] sm:$0xff] }
   0x8   :  { %519 = vmatprep.subr.bf16.mxu1 %v518_v8 }
   0x9   :  { %521 = vmatpush3.bf16.msra.mxu1 %v518_v8 }
   0xa   :  { %12 = vsyncpa [#allocation3], 0  ;;  %523 = vmatprep.subr.bf16.mxu1 %v522_v10  ;;  %v526_v13 = vpack.c.bf16 %v219_v12, %v218_v11  ;;  %v28_v14 = vld [vmem:[%s731_s0 + $0x8] sm:$0xff]  ;;  %v220_v15 = vld [vmem:[%s736_s5 + $0x30] sm:$0xff]  ;;  %vm321_vm4 = vcmask 261120  }
   0xb   :  { %v221_v16 = vld [vmem:[%s736_s5 + $0x38] sm:$0xff]  ;;  %v222_v18 = vld [vmem:[%s736_s5 + $0x40] sm:$0xff]  ;;  %v223_v19 = vld [vmem:[%s736_s5 + $0x48] sm:$0xff] }
   0xc   :  { %470 = vmatmul.mubr.msk.f32.vlgmr.msra.gmra.mrb[0].mxu0 %vm119_vm3, %v28_v14  ;;  %v530_v17 = vpack.c.bf16 %v221_v16, %v220_v15  ;;  %v534_v20 = vpack.c.bf16 %v223_v19, %v222_v18  ;;  %v224_v21 = vld [vmem:[%s736_s5 + $0x50] sm:$0xff]  ;;  %v225_v22 = vld [vmem:[%s736_s5 + $0x58] sm:$0xff]  ;;  %v226_v24 = vld [vmem:[%s736_s5 + $0x60] sm:$0xff] }
   0xd   :  { %525 = vmatpush3.bf16.msra.mxu1 %v522_v10  ;;  %v538_v23 = vpack.c.bf16 %v225_v22, %v224_v21  ;;  %v227_v25 = vld [vmem:[%s736_s5 + $0x68] sm:$0xff]  ;;  %v228_v27 = vld [vmem:[%s736_s5 + $0x70] sm:$0xff]  ;;  %v229_v28 = vld [vmem:[%s736_s5 + $0x78] sm:$0xff] }
   0xe   :  { %527 = vmatprep.subr.bf16.mxu1 %v526_v13  ;;  %v542_v26 = vpack.c.bf16 %v227_v25, %v226_v24  ;;  %v546_v29 = vpack.c.bf16 %v229_v28, %v228_v27  ;;  %v312_v30 = vld [vmem:[%s737_s6] sm:$0xff]  ;;  %v313_v31 = vld [vmem:[%s737_s6 + $0x8] sm:$0xff]  ;;  %v314_v40 = vld [vmem:[%s737_s6 + $0x10] sm:$0xff] }
   0xf   :  { %v550_v32 = vpack.c.bf16 %v313_v31, %v312_v30  ;;  %v427_v33 = vld [vmem:[%s735_s4] ss:$0 sm:$0xff]  ;;  %v315_v41 = vld [vmem:[%s737_s6 + $0x18] sm:$0xff]  ;;  %v428_v43 = vld [vmem:[%s735_s4 + $0x1] ss:$0 sm:$0xff]  ;;  %s587_s6 = smov [#allocation2]  }
  0x10   :  { %v554_v42 = vpack.c.bf16 %v315_v41, %v314_v40  ;;  %v429_v50 = vld [vmem:[%s735_s4 + $0x2] ss:$0 sm:$0xff]  ;;  %s410_s28 = sshll.u32 %s587_s6, 4  ;;  %s411_s28 = int_to_ptr.vmem [resolvable:$true] %s410_s28 }
  0x11   :  { %529 = vmatpush3.bf16.msra.mxu1 %v526_v13  ;;  %551 = vmatprep.subr.bf16.mxu0 %v550_v32  ;;  %s563_s29 = scalar_lea.vmem %s411_s28, 256  ;;  %p568_p1 = scmp.lt.s32.totalorder %s411_s28, %s411_s28 }
  0x12   :  { %531 = vmatprep.subr.bf16.mxu1 %v530_v17  ;;  %553 = vmatpush3.bf16.msra.mxu0 %v550_v32  ;;  %p564_p0 = scmp.ne.s32.totalorder %s411_s28, %s563_s29  ;;  %p569_p2 = scmp.lt.s32.totalorder %s563_s29, %s563_s29 }
  0x13   :  { %555 = vmatprep.subr.bf16.mxu0 %v554_v42 }
  0x14   :  { %p570_p3 = por %p569_p2, %p568_p1 }
  0x15   :  { %533 = vmatpush3.bf16.msra.mxu1 %v530_v17 }
  0x16   :  { %535 = vmatprep.subr.bf16.mxu1 %v534_v20  ;;  %557 = vmatpush3.bf16.msra.mxu0 %v554_v42  ;;  %p571_p4 = pnand %p570_p3, %p564_p0 }
  0x19   :  { %537 = vmatpush3.bf16.msra.mxu1 %v534_v20 }
  0x1a   :  { %539 = vmatprep.subr.bf16.mxu1 %v538_v23 }
  0x1d   :  { %541 = vmatpush3.bf16.msra.mxu1 %v538_v23 }
  0x1e   :  { %543 = vmatprep.subr.bf16.mxu1 %v542_v26 }
  0x21   :  { %545 = vmatpush3.bf16.msra.mxu1 %v542_v26 }
  0x22   :  { %547 = vmatprep.subr.bf16.mxu1 %v546_v29 }
  0x25   :  { %549 = vmatpush3.bf16.msra.mxu1 %v546_v29 }
  0xdf   :  { %v471_v34 = vpop.f32.mrb[0].mxu0 }
  0xe0   :  { %v211_v35 = vadd.f32 %v471_v34, %v427_v33  ;;  %v196_v36 = vpop.f32.mrb[1].mxu0 }
  0xe1   :  { %v210_v37 = vadd.f32 %v427_v33, %v196_v36 }
  0xe2   :  { %v213_v39 = vmax.f32 %v211_v35, 0.0 }
  0xe3   :  { %v212_v38 = vmax.f32 %v210_v37, 0.0 }
  0xe5   :  { %504 = vmatprep.mubr.f32.mxu1 %v212_v38 }
  0xe6   :  { %505 = vmatmul.mubr.f32.vlgmr.msra.gmra.mrb[0].mxu1 %v213_v39 }
 0x1b9   :  { %v506_v44 = vpop.f32.mrb[0].mxu1 }
 0x1ba   :  { %v307_v45 = vadd.f32 %v506_v44, %v428_v43  ;;  %v301_v46 = vpop.f32.mrb[1].mxu1 }
 0x1bb   :  { %v302_v47 = vadd.f32 %v428_v43, %v301_v46 }
 0x1bc   :  { %v311_v49 = vmax.f32 %v307_v45, 0.0 }
 0x1bd   :  { %v310_v48 = vmax.f32 %v302_v47, 0.0 }
 0x1bf   :  { %515 = vmatprep.mubr.msk.f32.mxu0 %vm321_vm4, %v310_v48 }
 0x1c0   :  { %516 = vmatmul.mubr.msk.f32.vlgmr.msra.gmra.mrb[2].mxu0 %vm321_vm4, %v311_v49 }
 0x293   :  { %v517_v51 = vpop.f32.mrb[2].mxu0 }
 0x294   :  { %v400_v52 = vadd.f32 %v517_v51, %v429_v50  ;;  %v394_v53 = vpop.f32.mrb[3].mxu0 }
 0x295   :  { %v395_v54 = vadd.f32 %v429_v50, %v394_v53 }
 0x296   :  { %404 = vst [vmem:[#allocation2 + $0x8] sm:$0xff] %v400_v52 }
 0x297   :  { %403 = vst [vmem:[#allocation2] sm:$0xff] %v395_v54 }
 0x298   :  { %574 = shalt.err (!%p571_p4)
}
 0x299   :  { %s575_s4 = scalar_lea.hbm %s738_s7, 256 }
 0x29a   :  { %p576_p5 = scmp.ne.s32.totalorder %s738_s7, %s575_s4  ;;  %p579_p6 = scmp.lt.u32.totalorder %s575_s4, %s738_s7 }
 0x29c   :  { %p581_p7 = pnand %p579_p6, %p576_p5 }
 0x29e   :  { %584 = shalt.err (!%p581_p7)
}
 0x29f   :  { %s588_s11 = smov 128   ;;  %s589_s12 = smov 8  }
 0x2a0   :  { %416 = dma.vmem_to_hbm [thread:$0]  %s411_s28, 256, %s738_s7, [#allocation3], %s588_s11, %s588_s11, %s589_s12  }
 0x2a1   :  { %585 = dma.done.wait [#allocation3], 256  }
 0x2a2   :  { %586 = vsyncadd [#allocation3], 4294967040 }
 0x2a3   :  { %420 = vsyncpa [#allocation3], 1 }

</bundles_post_ra>
